<compile_context>
chip_gen: v7x
topology: tpu7x:2x2x1
jax: 0.10.0
libtpu: 0.0.40
codegen_flags: <defaults>
</compile_context>

<pallas_src>
import jax
import jax.numpy as jnp
from jax.experimental import pallas as pl
from jax.experimental.pallas import tpu as pltpu

N = 8  # number of antennas (small synthetic size)


def z2_kernel(params_ref, h1_ref, h2_ref, out_ref):
    # params (SMEM, flat f32[11]): [rho2, mu2, c, v2[0:4], t[0:4]]
    rho2 = params_ref[0]
    mu2 = params_ref[1]
    c = params_ref[2]
    v2_2 = params_ref[5]
    v2_3 = params_ref[6]
    t0 = params_ref[7]
    t1 = params_ref[8]
    t2 = params_ref[9]
    t3 = params_ref[10]

    h1 = h1_ref[...]                      # (n, n)
    h2 = h2_ref[...]                      # (n, n)
    n = h1.shape[0]

    # Stacked / lane-packed channel operands (built in-kernel; no R input).
    g = jnp.concatenate([h1, h2], axis=0)     # (2n, n)  = [H1; H2]
    hl = jnp.concatenate([h1, h2], axis=1)    # (n, 2n)  = [H1 | H2]

    hi = jax.lax.Precision.HIGHEST
    # P1 = G @ G^T  : diag quadrants are A = H1 H1^T and B = H2 H2^T.
    p1 = jax.lax.dot_general(g, g, (((1,), (1,)), ((), ())),
                             preferred_element_type=jnp.float32, precision=hi)
    # P2 = G @ [H1|H2] : off-diag quadrants are X12 = H1 H2 and X21 = H2 H1.
    p2m = jnp.dot(g, hl, preferred_element_type=jnp.float32, precision=hi)

    s1 = rho2 + mu2 + c
    s2 = rho2 - mu2 + c

    lane = jax.lax.broadcasted_iota(jnp.int32, (n, 2 * n), 1)
    row = jax.lax.broadcasted_iota(jnp.int32, (n, 2 * n), 0)
    left = lane < n

    top1 = p1[0:n, :]        # [A        | H1 H2^T]
    bot1 = p1[n:, :]         # [H2 H1^T  | B      ]
    ab = jnp.where(left, top1, bot1)          # [A   | B  ]  (n, 2n)

    top2 = p2m[0:n, :]       # [H1 H1 | X12]
    bot2 = p2m[n:, :]        # [X21   | H2 H2]
    x = jnp.where(left, bot2, top2)           # [X21 | X12]  (n, 2n)

    # Lane-packed surrogate SDP covariances [W21 | W22] = [s1*A+mu2*I | s2*B+mu2*I],
    # produced by one lane-masked select + diagonal load, stored 16-lane dense.
    eye2 = ((lane == row) | (lane == row + n)).astype(jnp.float32)
    w_packed = jnp.where(left, s1, s2) * ab + mu2 * eye2
    out_ref[0:n, :] = w_packed

    # Fused Frobenius-norm reductions: one squared slab, two lane reduces,
    # then six tiny sublane-block sums.
    stack = jnp.concatenate([ab, x, hl], axis=0)          # (3n, 2n)
    ssq = stack * stack
    lsum = jnp.sum(ssq[:, 0:n], axis=1, keepdims=True)    # (3n, 1)
    rsum = jnp.sum(ssq[:, n:], axis=1, keepdims=True)     # (3n, 1)
    fro_a = jnp.sum(lsum[0:n], keepdims=True)             # ||H1 H1^T||_F^2
    fro_b = jnp.sum(rsum[0:n], keepdims=True)             # ||H2 H2^T||_F^2
    fro_x21 = jnp.sum(lsum[n:2 * n], keepdims=True)       # ||H2 H1||_F^2
    fro_x12 = jnp.sum(rsum[n:2 * n], keepdims=True)       # ||H1 H2||_F^2
    fro_h1 = jnp.sum(lsum[2 * n:3 * n], keepdims=True)    # ||H1||_F^2 = tr(H1 H1^T)
    fro_h2 = jnp.sum(rsum[2 * n:3 * n], keepdims=True)    # ||H2||_F^2 = tr(H2 H2^T)

    # p2 = trace(W21) + trace(W22) via exact identities.
    p2 = s1 * fro_h1 + s2 * fro_h2 + 2.0 * mu2 * n

    # Quadratic forms trace(Hj @ W2k @ Hj^T) via exact identities
    # (W2k = s*Gram + mu2*I), shifted by t / v2 as before.
    t121 = s1 * fro_x21 + mu2 * fro_h2 + t0
    t122 = s2 * fro_b + mu2 * fro_h2 + t1
    t211 = s1 * fro_a + mu2 * fro_h1 + t2 + v2_2
    t212 = s2 * fro_x12 + mu2 * fro_h1 + t3 + v2_3

    # Pack the five scalars into the spare row of the single output buffer.
    lane_row = jax.lax.broadcasted_iota(jnp.int32, (1, 2 * n), 1)
    srow = (jnp.where(lane_row == 0, p2, 0.0)
            + jnp.where(lane_row == 1, t121, 0.0)
            + jnp.where(lane_row == 2, t122, 0.0)
            + jnp.where(lane_row == 3, t211, 0.0)
            + jnp.where(lane_row == 4, t212, 0.0))
    out_ref[n:n + 1, :] = srow


def z2_layer_forward(rho2, mu2, v2, t, H1, H2, c):
    """Mirrors Z2_Layer.forward(rho2, mu2, v2, t, H1, H2, c)."""
    f32 = jnp.float32
    H1_a = jnp.asarray(H1, f32)
    H2_a = jnp.asarray(H2, f32)
    n = H1_a.shape[0]

    # Single packed SMEM scalar vector: [rho2, mu2, c, v2(4), t(4)].
    params = jnp.concatenate([
        jnp.asarray(rho2, f32).reshape(1),
        jnp.asarray(mu2, f32).reshape(1),
        jnp.asarray(c, f32).reshape(1),
        jnp.asarray(v2, f32).reshape(4),
        jnp.asarray(t, f32).reshape(4),
    ])

    smem = pl.BlockSpec(memory_space=pltpu.MemorySpace.SMEM)
    vmem = pl.BlockSpec(memory_space=pltpu.MemorySpace.VMEM)

    # Single output slab: rows 0..n-1 = [W21 | W22], row n = scalars.
    out_shape = jax.ShapeDtypeStruct((n + 1, 2 * n), f32)

    cost = pl.CostEstimate(
        flops=2 * 2 * (2 * n) * n * (2 * n),                     # two tiny MXU dots
        transcendentals=0,
        bytes_accessed=params.size * 4 + 2 * n * n * 4 + (n + 1) * 2 * n * 4,
    )

    out = pl.pallas_call(
        z2_kernel,
        out_shape=out_shape,
        in_specs=[smem, vmem, vmem],
        out_specs=vmem,
        cost_estimate=cost,
    )(params, H1_a, H2_a)

    W21 = out[0:n, 0:n]
    W22 = out[0:n, n:2 * n]
    return (out[n, 0], W21, W22, out[n, 1], out[n, 2], out[n, 3], out[n, 4])


if __name__ == "__main__":
    key = jax.random.PRNGKey(0)
    k1, k2, k3, k4 = jax.random.split(key, 4)

    # Deterministic synthetic inputs matching the module's expected shapes.
    rho2 = jnp.float32(0.7)
    mu2 = jnp.float32(0.3)
    c = jnp.float32(1.5)
    v2 = jax.random.normal(k1, (4, 1), jnp.float32)
    t = jax.random.normal(k2, (4, 1), jnp.float32)
    H1 = jax.random.normal(k3, (N, N), jnp.float32)
    H2 = jax.random.normal(k4, (N, N), jnp.float32)

    out = z2_layer_forward(rho2, mu2, v2, t, H1, H2, c)
    jax.block_until_ready(out)

    p2, W21, W22, t121, t122, t211, t212 = out
    assert W21.shape == (N, N) and W22.shape == (N, N)
    assert p2.shape == () and t211.shape == ()
    print("KERNEL_OK")
</pallas_src>

<mosaic_0001>
module attributes {stable_mosaic.version = 11 : i64} {
  func.func @z2_kernel(%arg0: memref<11xf32, #tpu.memory_space<smem>>, %arg1: memref<8x8xf32, #tpu.memory_space<vmem>>, %arg2: memref<8x8xf32, #tpu.memory_space<vmem>>, %arg3: memref<9x16xf32, #tpu.memory_space<vmem>>) attributes {dimension_semantics = [], scalar_prefetch = 0 : i64, scratch_operands = 0 : i64, tpu.core_type = #tpu.core_type<tc>} {
    %c0 = arith.constant 0 : index
    %0 = memref.load %arg0[%c0] : memref<11xf32, #tpu.memory_space<smem>>
    %c1 = arith.constant 1 : index
    %1 = memref.load %arg0[%c1] : memref<11xf32, #tpu.memory_space<smem>>
    %c2 = arith.constant 2 : index
    %2 = memref.load %arg0[%c2] : memref<11xf32, #tpu.memory_space<smem>>
    %c5 = arith.constant 5 : index
    %3 = memref.load %arg0[%c5] : memref<11xf32, #tpu.memory_space<smem>>
    %c6 = arith.constant 6 : index
    %4 = memref.load %arg0[%c6] : memref<11xf32, #tpu.memory_space<smem>>
    %c7 = arith.constant 7 : index
    %5 = memref.load %arg0[%c7] : memref<11xf32, #tpu.memory_space<smem>>
    %c8 = arith.constant 8 : index
    %6 = memref.load %arg0[%c8] : memref<11xf32, #tpu.memory_space<smem>>
    %c9 = arith.constant 9 : index
    %7 = memref.load %arg0[%c9] : memref<11xf32, #tpu.memory_space<smem>>
    %c10 = arith.constant 10 : index
    %8 = memref.load %arg0[%c10] : memref<11xf32, #tpu.memory_space<smem>>
    %c0_0 = arith.constant 0 : index
    %c0_1 = arith.constant 0 : index
    %9 = vector.load %arg1[%c0_0, %c0_1] : memref<8x8xf32, #tpu.memory_space<vmem>>, vector<8x8xf32>
    %c0_2 = arith.constant 0 : index
    %c0_3 = arith.constant 0 : index
    %10 = vector.load %arg2[%c0_2, %c0_3] : memref<8x8xf32, #tpu.memory_space<vmem>>, vector<8x8xf32>
    %11 = tpu.concatenate %9, %10 in 0 : vector<8x8xf32>, vector<8x8xf32> -> vector<16x8xf32>
    %12 = tpu.concatenate %9, %10 in 1 : vector<8x8xf32>, vector<8x8xf32> -> vector<8x16xf32>
    %cst = arith.constant dense<0.000000e+00> : vector<16x16xf32>
    %13 = tpu.matmul %11, %11, %cst {dimension_numbers = #tpu.dot_dimension_numbers<[1], [1], [0], [0], [0, 0, 1, 0], [], []>, precision = #tpu.contract_precision<fp32>} : vector<16x8xf32>, vector<16x8xf32>, vector<16x16xf32> -> vector<16x16xf32>
    %cst_4 = arith.constant dense<0.000000e+00> : vector<16x16xf32>
    %14 = tpu.matmul %11, %12, %cst_4 {dimension_numbers = #tpu.dot_dimension_numbers<[1], [0], [0], [1], [0, 0, 1, 1], [], []>, precision = #tpu.contract_precision<fp32>} : vector<16x8xf32>, vector<8x16xf32>, vector<16x16xf32> -> vector<16x16xf32>
    %15 = arith.addf %0, %1 : f32
    %16 = arith.addf %15, %2 : f32
    %17 = arith.subf %0, %1 : f32
    %18 = arith.addf %17, %2 : f32
    %19 = tpu.iota {dimensions = array<i32: 1>} : vector<8x16xi32>
    %20 = tpu.iota {dimensions = array<i32: 0>} : vector<8x16xi32>
    %c8_i32 = arith.constant 8 : i32
    %21 = vector.broadcast %c8_i32 : i32 to vector<8x16xi32>
    %22 = arith.cmpi slt, %19, %21 : vector<8x16xi32>
    %23 = vector.extract_strided_slice %13 {offsets = [0, 0], sizes = [8, 16], strides = [1, 1]} : vector<16x16xf32> to vector<8x16xf32>
    %24 = vector.extract_strided_slice %13 {offsets = [8, 0], sizes = [8, 16], strides = [1, 1]} : vector<16x16xf32> to vector<8x16xf32>
    %25 = arith.select %22, %23, %24 : vector<8x16xi1>, vector<8x16xf32>
    %26 = vector.extract_strided_slice %14 {offsets = [0, 0], sizes = [8, 16], strides = [1, 1]} : vector<16x16xf32> to vector<8x16xf32>
    %27 = vector.extract_strided_slice %14 {offsets = [8, 0], sizes = [8, 16], strides = [1, 1]} : vector<16x16xf32> to vector<8x16xf32>
    %28 = arith.select %22, %27, %26 : vector<8x16xi1>, vector<8x16xf32>
    %29 = arith.cmpi eq, %19, %20 : vector<8x16xi32>
    %c8_i32_5 = arith.constant 8 : i32
    %30 = vector.broadcast %c8_i32_5 : i32 to vector<8x16xi32>
    %31 = arith.addi %20, %30 : vector<8x16xi32>
    %32 = arith.cmpi eq, %19, %31 : vector<8x16xi32>
    %33 = arith.ori %29, %32 : vector<8x16xi1>
    %34 = arith.extui %33 : vector<8x16xi1> to vector<8x16xi32>
    %35 = arith.sitofp %34 : vector<8x16xi32> to vector<8x16xf32>
    %36 = vector.broadcast %16 : f32 to vector<8x16xf32>
    %37 = vector.broadcast %18 : f32 to vector<8x16xf32>
    %38 = arith.select %22, %36, %37 : vector<8x16xi1>, vector<8x16xf32>
    %39 = arith.mulf %38, %25 : vector<8x16xf32>
    %40 = vector.broadcast %1 : f32 to vector<8x16xf32>
    %41 = arith.mulf %40, %35 : vector<8x16xf32>
    %42 = arith.addf %39, %41 : vector<8x16xf32>
    %c0_6 = arith.constant 0 : index
    %c0_7 = arith.constant 0 : index
    %43 = vector.load %arg3[%c0_6, %c0_7] : memref<9x16xf32, #tpu.memory_space<vmem>>, vector<8x16xf32>
    tpu.vector_store %arg3[%c0_6, %c0_7], %42 {strides = array<i32>} : memref<9x16xf32, #tpu.memory_space<vmem>>, vector<8x16xf32>,
    %44 = tpu.concatenate %25, %28, %12 in 0 : vector<8x16xf32>, vector<8x16xf32>, vector<8x16xf32> -> vector<24x16xf32>
    %45 = arith.mulf %44, %44 : vector<24x16xf32>
    %46 = vector.extract_strided_slice %45 {offsets = [0, 0], sizes = [24, 8], strides = [1, 1]} : vector<24x16xf32> to vector<24x8xf32>
    %cst_8 = arith.constant dense<0.000000e+00> : vector<24xf32>
    %47 = vector.multi_reduction <add>, %46, %cst_8 [1] : vector<24x8xf32> to vector<24xf32>
    %48 = vector.shape_cast %47 : vector<24xf32> to vector<24x1xf32>
    %49 = vector.extract_strided_slice %45 {offsets = [0, 8], sizes = [24, 8], strides = [1, 1]} : vector<24x16xf32> to vector<24x8xf32>
    %cst_9 = arith.constant dense<0.000000e+00> : vector<24xf32>
    %50 = vector.multi_reduction <add>, %49, %cst_9 [1] : vector<24x8xf32> to vector<24xf32>
    %51 = vector.shape_cast %50 : vector<24xf32> to vector<24x1xf32>
    %52 = vector.extract_strided_slice %48 {offsets = [0, 0], sizes = [8, 1], strides = [1, 1]} : vector<24x1xf32> to vector<8x1xf32>
    %53 = vector.shape_cast %52 : vector<8x1xf32> to vector<1x8x1xf32>
    %cst_10 = arith.constant dense<0.000000e+00> : vector<1xf32>
    %54 = vector.multi_reduction <add>, %53, %cst_10 [1, 2] : vector<1x8x1xf32> to vector<1xf32>
    %55 = vector.shape_cast %54 : vector<1xf32> to vector<1x1x1xf32>
    %56 = vector.extract %55[0, 0, 0] : f32 from vector<1x1x1xf32>
    %57 = vector.broadcast %56 : f32 to vector<1x1xf32>
    %58 = vector.extract_strided_slice %51 {offsets = [0, 0], sizes = [8, 1], strides = [1, 1]} : vector<24x1xf32> to vector<8x1xf32>
    %59 = vector.shape_cast %58 : vector<8x1xf32> to vector<1x8x1xf32>
    %cst_11 = arith.constant dense<0.000000e+00> : vector<1xf32>
    %60 = vector.multi_reduction <add>, %59, %cst_11 [1, 2] : vector<1x8x1xf32> to vector<1xf32>
    %61 = vector.shape_cast %60 : vector<1xf32> to vector<1x1x1xf32>
    %62 = vector.extract %61[0, 0, 0] : f32 from vector<1x1x1xf32>
    %63 = vector.broadcast %62 : f32 to vector<1x1xf32>
    %64 = vector.extract_strided_slice %48 {offsets = [8, 0], sizes = [8, 1], strides = [1, 1]} : vector<24x1xf32> to vector<8x1xf32>
    %65 = vector.shape_cast %64 : vector<8x1xf32> to vector<1x8x1xf32>
    %cst_12 = arith.constant dense<0.000000e+00> : vector<1xf32>
    %66 = vector.multi_reduction <add>, %65, %cst_12 [1, 2] : vector<1x8x1xf32> to vector<1xf32>
    %67 = vector.shape_cast %66 : vector<1xf32> to vector<1x1x1xf32>
    %68 = vector.extract %67[0, 0, 0] : f32 from vector<1x1x1xf32>
    %69 = vector.broadcast %68 : f32 to vector<1x1xf32>
    %70 = vector.extract_strided_slice %51 {offsets = [8, 0], sizes = [8, 1], strides = [1, 1]} : vector<24x1xf32> to vector<8x1xf32>
    %71 = vector.shape_cast %70 : vector<8x1xf32> to vector<1x8x1xf32>
    %cst_13 = arith.constant dense<0.000000e+00> : vector<1xf32>
    %72 = vector.multi_reduction <add>, %71, %cst_13 [1, 2] : vector<1x8x1xf32> to vector<1xf32>
    %73 = vector.shape_cast %72 : vector<1xf32> to vector<1x1x1xf32>
    %74 = vector.extract %73[0, 0, 0] : f32 from vector<1x1x1xf32>
    %75 = vector.broadcast %74 : f32 to vector<1x1xf32>
    %76 = vector.extract_strided_slice %48 {offsets = [16, 0], sizes = [8, 1], strides = [1, 1]} : vector<24x1xf32> to vector<8x1xf32>
    %77 = vector.shape_cast %76 : vector<8x1xf32> to vector<1x8x1xf32>
    %cst_14 = arith.constant dense<0.000000e+00> : vector<1xf32>
    %78 = vector.multi_reduction <add>, %77, %cst_14 [1, 2] : vector<1x8x1xf32> to vector<1xf32>
    %79 = vector.shape_cast %78 : vector<1xf32> to vector<1x1x1xf32>
    %80 = vector.extract %79[0, 0, 0] : f32 from vector<1x1x1xf32>
    %81 = vector.broadcast %80 : f32 to vector<1x1xf32>
    %82 = vector.extract_strided_slice %51 {offsets = [16, 0], sizes = [8, 1], strides = [1, 1]} : vector<24x1xf32> to vector<8x1xf32>
    %83 = vector.shape_cast %82 : vector<8x1xf32> to vector<1x8x1xf32>
    %cst_15 = arith.constant dense<0.000000e+00> : vector<1xf32>
    %84 = vector.multi_reduction <add>, %83, %cst_15 [1, 2] : vector<1x8x1xf32> to vector<1xf32>
    %85 = vector.shape_cast %84 : vector<1xf32> to vector<1x1x1xf32>
    %86 = vector.extract %85[0, 0, 0] : f32 from vector<1x1x1xf32>
    %87 = vector.broadcast %86 : f32 to vector<1x1xf32>
    %88 = vector.broadcast %16 : f32 to vector<1x1xf32>
    %89 = arith.mulf %88, %81 : vector<1x1xf32>
    %90 = vector.broadcast %18 : f32 to vector<1x1xf32>
    %91 = arith.mulf %90, %87 : vector<1x1xf32>
    %92 = arith.addf %89, %91 : vector<1x1xf32>
    %cst_16 = arith.constant 2.000000e+00 : f32
    %93 = arith.mulf %cst_16, %1 : f32
    %cst_17 = arith.constant 8.000000e+00 : f32
    %94 = arith.mulf %93, %cst_17 : f32
    %95 = vector.broadcast %94 : f32 to vector<1x1xf32>
    %96 = arith.addf %92, %95 : vector<1x1xf32>
    %97 = vector.broadcast %16 : f32 to vector<1x1xf32>
    %98 = arith.mulf %97, %69 : vector<1x1xf32>
    %99 = vector.broadcast %1 : f32 to vector<1x1xf32>
    %100 = arith.mulf %99, %87 : vector<1x1xf32>
    %101 = arith.addf %98, %100 : vector<1x1xf32>
    %102 = vector.broadcast %5 : f32 to vector<1x1xf32>
    %103 = arith.addf %101, %102 : vector<1x1xf32>
    %104 = vector.broadcast %18 : f32 to vector<1x1xf32>
    %105 = arith.mulf %104, %63 : vector<1x1xf32>
    %106 = vector.broadcast %1 : f32 to vector<1x1xf32>
    %107 = arith.mulf %106, %87 : vector<1x1xf32>
    %108 = arith.addf %105, %107 : vector<1x1xf32>
    %109 = vector.broadcast %6 : f32 to vector<1x1xf32>
    %110 = arith.addf %108, %109 : vector<1x1xf32>
    %111 = vector.broadcast %16 : f32 to vector<1x1xf32>
    %112 = arith.mulf %111, %57 : vector<1x1xf32>
    %113 = vector.broadcast %1 : f32 to vector<1x1xf32>
    %114 = arith.mulf %113, %81 : vector<1x1xf32>
    %115 = arith.addf %112, %114 : vector<1x1xf32>
    %116 = vector.broadcast %7 : f32 to vector<1x1xf32>
    %117 = arith.addf %115, %116 : vector<1x1xf32>
    %118 = vector.broadcast %3 : f32 to vector<1x1xf32>
    %119 = arith.addf %117, %118 : vector<1x1xf32>
    %120 = vector.broadcast %18 : f32 to vector<1x1xf32>
    %121 = arith.mulf %120, %75 : vector<1x1xf32>
    %122 = vector.broadcast %1 : f32 to vector<1x1xf32>
    %123 = arith.mulf %122, %81 : vector<1x1xf32>
    %124 = arith.addf %121, %123 : vector<1x1xf32>
    %125 = vector.broadcast %8 : f32 to vector<1x1xf32>
    %126 = arith.addf %124, %125 : vector<1x1xf32>
    %127 = vector.broadcast %4 : f32 to vector<1x1xf32>
    %128 = arith.addf %126, %127 : vector<1x1xf32>
    %129 = tpu.iota {dimensions = array<i32: 1>} : vector<1x16xi32>
    %c0_i32 = arith.constant 0 : i32
    %130 = vector.broadcast %c0_i32 : i32 to vector<1x16xi32>
    %131 = arith.cmpi eq, %129, %130 : vector<1x16xi32>
    %cst_18 = arith.constant 0.000000e+00 : f32
    %132 = vector.shape_cast %96 : vector<1x1xf32> to vector<1x1xf32>
    %133 = vector.broadcast %132 : vector<1x1xf32> to vector<1x16xf32>
    %134 = vector.broadcast %cst_18 : f32 to vector<1x16xf32>
    %135 = arith.select %131, %133, %134 : vector<1x16xi1>, vector<1x16xf32>
    %c1_i32 = arith.constant 1 : i32
    %136 = vector.broadcast %c1_i32 : i32 to vector<1x16xi32>
    %137 = arith.cmpi eq, %129, %136 : vector<1x16xi32>
    %cst_19 = arith.constant 0.000000e+00 : f32
    %138 = vector.shape_cast %103 : vector<1x1xf32> to vector<1x1xf32>
    %139 = vector.broadcast %138 : vector<1x1xf32> to vector<1x16xf32>
    %140 = vector.broadcast %cst_19 : f32 to vector<1x16xf32>
    %141 = arith.select %137, %139, %140 : vector<1x16xi1>, vector<1x16xf32>
    %142 = arith.addf %135, %141 : vector<1x16xf32>
    %c2_i32 = arith.constant 2 : i32
    %143 = vector.broadcast %c2_i32 : i32 to vector<1x16xi32>
    %144 = arith.cmpi eq, %129, %143 : vector<1x16xi32>
    %cst_20 = arith.constant 0.000000e+00 : f32
    %145 = vector.shape_cast %110 : vector<1x1xf32> to vector<1x1xf32>
    %146 = vector.broadcast %145 : vector<1x1xf32> to vector<1x16xf32>
    %147 = vector.broadcast %cst_20 : f32 to vector<1x16xf32>
    %148 = arith.select %144, %146, %147 : vector<1x16xi1>, vector<1x16xf32>
    %149 = arith.addf %142, %148 : vector<1x16xf32>
    %c3_i32 = arith.constant 3 : i32
    %150 = vector.broadcast %c3_i32 : i32 to vector<1x16xi32>
    %151 = arith.cmpi eq, %129, %150 : vector<1x16xi32>
    %cst_21 = arith.constant 0.000000e+00 : f32
    %152 = vector.shape_cast %119 : vector<1x1xf32> to vector<1x1xf32>
    %153 = vector.broadcast %152 : vector<1x1xf32> to vector<1x16xf32>
    %154 = vector.broadcast %cst_21 : f32 to vector<1x16xf32>
    %155 = arith.select %151, %153, %154 : vector<1x16xi1>, vector<1x16xf32>
    %156 = arith.addf %149, %155 : vector<1x16xf32>
    %c4_i32 = arith.constant 4 : i32
    %157 = vector.broadcast %c4_i32 : i32 to vector<1x16xi32>
    %158 = arith.cmpi eq, %129, %157 : vector<1x16xi32>
    %cst_22 = arith.constant 0.000000e+00 : f32
    %159 = vector.shape_cast %128 : vector<1x1xf32> to vector<1x1xf32>
    %160 = vector.broadcast %159 : vector<1x1xf32> to vector<1x16xf32>
    %161 = vector.broadcast %cst_22 : f32 to vector<1x16xf32>
    %162 = arith.select %158, %160, %161 : vector<1x16xi1>, vector<1x16xf32>
    %163 = arith.addf %156, %162 : vector<1x16xf32>
    %c8_23 = arith.constant 8 : index
    %c0_24 = arith.constant 0 : index
    %164 = vector.load %arg3[%c8_23, %c0_24] : memref<9x16xf32, #tpu.memory_space<vmem>>, vector<1x16xf32>
    tpu.vector_store %arg3[%c8_23, %c0_24], %163 {strides = array<i32>} : memref<9x16xf32, #tpu.memory_space<vmem>>, vector<1x16xf32>,
    return
  }
}

</mosaic_0001>

<bundles_post_ra>
// kernel: tpu_custom_call.1
= control target key start
LH: loop header
LB: loop body
LE: loop exit
PB: predicated region body
PF: predicated region fallthrough
CT: control target
= control target key end

     0   :  { %8 = vsyncpa [#allocation5], 0  ;;  %s1700_s0 = inlined_call_operand.hbm [shape: f32[11], index: 0, kind: input, shape index: {}]   ;;  %s1701_s1 = inlined_call_operand.hbm [shape: f32[8,8], index: 1, kind: input, shape index: {}]   ;;  %s1702_s2 = inlined_call_operand.hbm [shape: f32[8,8], index: 2, kind: input, shape index: {}]   ;;  %s1703_s3 = inlined_call_operand.hbm [shape: f32[9,16], index: 3, kind: output, shape index: {}]  }
   0x1   :  { %9 = vsyncpa [#allocation3], 0 }
   0x2   :  { %10 = vsyncpa [#allocation8], 0 }
   0x3   :  { %11 = vsyncpa [#allocation4], 0  ;;  %s1440_s14 = scalar_lea.hbm %s1700_s0, 16 }
   0x4   :  { %p1441_p0 = scmp.ne.s32.totalorder %s1700_s0, %s1440_s14  ;;  %p1444_p1 = scmp.lt.u32.totalorder %s1440_s14, %s1700_s0 }
   0x6   :  { %p1446_p2 = pnand %p1444_p1, %p1441_p0 }
   0x8   :  { %1449 = shalt.err (!%p1446_p2)
}
   0x9   :  { %s1524_s19 = smov [#allocation2]   ;;  %s1525_s22 = smov [#allocation6]  }
   0xa   :  { %19 = dma.hbm_to_smem %s1700_s0, 16, %s1524_s19, [#allocation5]  }
   0xb   :  { %s26_s23 = sshll.u32 %s1525_s22, 4  ;;  %s1526_s24 = smov [#allocation7]   ;;  %s27_s23 = int_to_ptr.vmem [resolvable:$true] %s26_s23 }
   0xc   :  { %s36_s25 = sshll.u32 %s1526_s24, 4  ;;  %s1450_s28 = scalar_lea.hbm %s1701_s1, 128  ;;  %s37_s25 = int_to_ptr.vmem [resolvable:$true] %s36_s25 }
   0xd   :  { %p1451_p3 = scmp.ne.s32.totalorder %s1701_s1, %s1450_s28  ;;  %p1454_p4 = scmp.lt.u32.totalorder %s1450_s28, %s1701_s1 }
   0xf   :  { %p1456_p5 = pnand %p1454_p4, %p1451_p3 }
  0x11   :  { %1459 = shalt.err (!%p1456_p5)
}
  0x12   :  { %s1460_s0 = scalar_lea.vmem %s27_s23, 128  ;;  %p1465_p7 = scmp.lt.s32.totalorder %s27_s23, %s27_s23 }
  0x13   :  { %p1461_p6 = scmp.ne.s32.totalorder %s27_s23, %s1460_s0  ;;  %p1466_p8 = scmp.lt.s32.totalorder %s1460_s0, %s1460_s0 }
  0x15   :  { %p1467_p9 = por %p1466_p8, %p1465_p7 }
  0x17   :  { %p1468_p10 = pnand %p1467_p9, %p1461_p6 }
  0x19   :  { %1471 = shalt.err (!%p1468_p10)
}
  0x1a   :  { %29 = dma.hbm_to_vmem [thread:$0]  %s1701_s1, 128, %s27_s23, [#allocation3]  }
  0x1b   :  { %s1472_s10 = scalar_lea.hbm %s1702_s2, 128 }
  0x1c   :  { %p1473_p11 = scmp.ne.s32.totalorder %s1702_s2, %s1472_s10  ;;  %p1476_p12 = scmp.lt.u32.totalorder %s1472_s10, %s1702_s2 }
  0x1e   :  { %p1478_p13 = pnand %p1476_p12, %p1473_p11 }
  0x20   :  { %1481 = shalt.err (!%p1478_p13)
}
  0x21   :  { %s1482_s15 = scalar_lea.vmem %s37_s25, 128  ;;  %p1487_p1 = scmp.lt.s32.totalorder %s37_s25, %s37_s25 }
  0x22   :  { %p1483_p0 = scmp.ne.s32.totalorder %s37_s25, %s1482_s15  ;;  %p1488_p2 = scmp.lt.s32.totalorder %s1482_s15, %s1482_s15 }
  0x24   :  { %p1489_p3 = por %p1488_p2, %p1487_p1 }
  0x26   :  { %p1490_p4 = pnand %p1489_p3, %p1483_p0 }
  0x28   :  { %1493 = shalt.err (!%p1490_p4)
}
  0x29   :  { %39 = dma.hbm_to_vmem [thread:$0]  %s1702_s2, 128, %s37_s25, [#allocation8]  }
  0x2a   :  { %1516 = dma.done.wait [#allocation5], 16  }
  0x2b   :  { %1517 = vsyncadd [#allocation5], 4294967280 }
  0x2c   :  { %1518 = dma.done.wait [#allocation3], 128  }
  0x2d   :  { %1519 = vsyncadd [#allocation3], 4294967168 }
  0x2e   :  { %1520 = dma.done.wait [#allocation8], 128  }
  0x2f   :  { %1521 = vsyncadd [#allocation8], 4294967168 }
  0x30   :  { %49 = sfence }
  0x31   :  { %v60_v0 = vld [vmem:[#allocation7] sm:$0xff]  ;;  %vm65_vm0 = vcmask 64512   ;;  %v59_v1 = vld [vmem:[#allocation6] sm:$0xff]  ;;  %s1527_s17 = smov 8   ;;  %s50_s2 = sld [smem:[#allocation2]]  ;;  %v1067_v27 = vlaneseq  ;;  %v1528_v34 = vmov 0.0  }
  0x32   :  { %62 = vrot.lane.b32.xlu0 %v60_v0, %s1527_s17  ;;  %v70_v2 = vsel %vm65_vm0, %v60_v0, 0  ;;  %v68_v3 = vsel %vm65_vm0, %v59_v1, 0  ;;  %s1616_s18 = sld [smem:[#allocation2 + $0x1]]  ;;  %s1254_s19 = sld [smem:[#allocation2 + $0x2]]  ;;  %vm1087_vm5 = vcmask 130048   ;;  %vm1122_vm6 = vcmask 7168  }
  0x33   :  { %v1591_v4 = vand.u32 4294901760, %v70_v2  ;;  %v1593_v5 = vand.u32 4294901760, %v68_v3  ;;  %v1070_v28 = vshrl.u32 %v1067_v27, 7  ;;  %v1620_v30 = vand.u32 127, %v1067_v27  ;;  %s1529_s24 = smov 120   ;;  %s1655_s26 = sld [smem:[#allocation2 + $0x9]] }
  0x34   :  { %s1657_s28 = sld [smem:[#allocation2 + $0xa]]  ;;  %s1659_s29 = sld [smem:[#allocation2 + $0x7]]  ;;  %vm1232_vm12 = vcmask 122880  }
  0x35   :  { %v150_v6 = vsub.f32 %v70_v2, %v1591_v4  ;;  %v140_v7 = vsub.f32 %v68_v3, %v1593_v5  ;;  %1315 = vmatprep.mubr.f32.mxu0 %v1593_v5  ;;  %v1376_v8 = vpack.c.bf16 %v1591_v4, %v1593_v5  ;;  %v1075_v29 = vadd.s32 8, %v1070_v28  ;;  %s1661_s30 = sld [smem:[#allocation2 + $0x8]]  ;;  %s1664_s6 = sld [smem:[#allocation2 + $0x5]] }
  0x36   :  { %vm1074_vm1 = vcmp.eq.s32.totalorder %v1620_v30, %v1070_v28  ;;  %vm1071_vm4 = vcmp.lt.s32.totalorder %v1620_v30, 8  ;;  %s1668_s8 = sld [smem:[#allocation2 + $0x6]]  ;;  %vm1218_vm7 = vcmp.eq.s32.totalorder %v1620_v30, 0  ;;  %vm1220_vm8 = vcmp.eq.s32.totalorder %v1620_v30, 1  ;;  %s1530_s11 = smov [#allocation9]  }
  0x37   :  { %v141_v9 = vand.u32 4294901760, %v140_v7  ;;  %v151_v10 = vand.u32 4294901760, %v150_v6  ;;  %1377 = vmatprep.subr.bf16.mxu1 %v1376_v8  ;;  %v1384_v16 = vpack.c.bf16 %v150_v6, %v140_v7  ;;  %vm1076_vm2 = vcmp.eq.s32.totalorder %v1620_v30, %v1075_v29  ;;  %s1239_s12 = sshll.u32 %s1530_s11, 4  ;;  %s1240_s12 = int_to_ptr.vmem [resolvable:$true] %s1239_s12 }
  0x38   :  { %1379 = vmatpush3.bf16.xpose.msra.mxu1 %v1376_v8  ;;  %s1063_s20 = sadd.f32 %s1616_s18, %s50_s2  ;;  %vm1077_vm3 = vmor %vm1074_vm1, %vm1076_vm2  ;;  %v1629_v36 = vstv %s1616_s18  ;;  %s1192_s5 = smul.f32 2.0, %s1616_s18  ;;  %vm1223_vm9 = vcmp.eq.s32.totalorder %v1620_v30, 2  ;;  %vm1226_vm10 = vcmp.eq.s32.totalorder %v1620_v30, 3  ;;  %vm1229_vm11 = vcmp.eq.s32.totalorder %v1620_v30, 4 }
  0x39   :  { %v142_v11 = vsub.f32 %v140_v7, %v141_v9  ;;  %v152_v12 = vsub.f32 %v150_v6, %v151_v10  ;;  %v1392_v17 = vpack.c.bf16 %v151_v10, %v141_v9  ;;  %s1065_s21 = ssub.f32 %s50_s2, %s1616_s18  ;;  %v1261_v35 = vsel %vm1077_vm3, 1.0, %v1528_v34  ;;  %s1494_s13 = scalar_lea.vmem %s1240_s12, 256 }
  0x3a   :  { %s1064_s22 = sadd.f32 %s1254_s19, %s1063_s20  ;;  %v1085_v41 = vmul.f32 %v1261_v35, %v1629_v36  ;;  %s1193_s9 = smul.f32 8.0, %s1192_s5 }
  0x3b   :  { %v143_v13 = vand.u32 4294901760, %v142_v11  ;;  %v153_v14 = vand.u32 4294901760, %v152_v12  ;;  %s1066_s23 = sadd.f32 %s1254_s19, %s1065_s21  ;;  %p1495_p5 = scmp.ne.s32.totalorder %s1240_s12, %s1494_s13 }
  0x3c   :  { %v1624_v31 = vstv %s1064_s22  ;;  %p1499_p6 = scmp.lt.s32.totalorder %s1240_s12, %s1240_s12  ;;  %p1500_p7 = scmp.lt.s32.totalorder %s1494_s13, %s1494_s13 }
  0x3d   :  { %v1380_v15 = vpack.c.bf16 %v153_v14, %v143_v13  ;;  %1308 = vmatprep.mubr.f32.mxu1 %v143_v13  ;;  %v1626_v32 = vstv %s1066_s23 }
  0x3e   :  { %v1082_v40 = vsel %vm1071_vm4, %v1624_v31, %v1626_v32  ;;  %p1501_p8 = por %p1500_p7, %p1499_p6 }
  0x3f   :  { %1381 = vmatprep.subr.bf16.mxu0 %v1380_v15  ;;  %1309 = vmatmul.mubr.f32.vlgmr.msra.gmra.mrb[0].mxu1 %v153_v14 }
  0x40   :  { %1383 = vmatpush3.bf16.xpose.msra.mxu0 %v1380_v15  ;;  %1348 = vmatprep.mubr.f32.mxu1 %v143_v13  ;;  %p1502_p9 = pnand %p1501_p8, %p1495_p5 }
  0x41   :  { %1385 = vmatprep.subr.bf16.mxu0 %v1384_v16 }
  0x47   :  { %1316 = vmatmul.mubr.f32.vlgmr.msra.gmra.mrb[0].mxu0 %v1591_v4 }
  0x48   :  { %1387 = vmatpush3.bf16.xpose.msra.mxu0 %v1384_v16  ;;  %1322 = vmatprep.mubr.f32.mxu0 %v140_v7 }
  0x49   :  { %1389 = vmatprep.subr.bf16.mxu0 %v1376_v8 }
  0x4f   :  { %1323 = vmatmul.mubr.f32.vlgmr.msra.gmra.mrb[0].mxu0 %v150_v6 }
  0x50   :  { %1391 = vmatpush3.bf16.xpose.msra.mxu0 %v1376_v8  ;;  %1329 = vmatprep.mubr.f32.mxu0 %v141_v9 }
  0x51   :  { %1393 = vmatprep.subr.bf16.mxu0 %v1392_v17 }
  0x57   :  { %1330 = vmatmul.mubr.f32.vlgmr.msra.gmra.mrb[0].mxu0 %v151_v10 }
  0x58   :  { %1395 = vmatpush3.bf16.xpose.msra.mxu0 %v1392_v17  ;;  %1336 = vmatprep.mubr.f32.mxu0 %v1593_v5 }
  0x59   :  { %1397 = vmatprep.subr.bf16.mxu0 %v1376_v8 }
  0x5f   :  { %1337 = vmatmul.mubr.f32.vlgmr.msra.gmra.mrb[0].mxu0 %v1591_v4 }
  0x60   :  { %1399 = vmatpush3.bf16.xpose.msra.mxu0 %v1376_v8  ;;  %1343 = vmatprep.mubr.f32.mxu0 %v1593_v5 }
  0x67   :  { %1344 = vmatmul.mubr.f32.vlgmr.msra.gmra.mrb[0].mxu0 %v1591_v4 }
  0xa4   :  { %v63_v18 = vpop.permute.xlu0 %62 }
  0xa5   :  { %v1606_v19 = vsel %vm65_vm0, %v59_v1, %v63_v18 }
  0xa6   :  { %v575_v20 = vand.u32 4294901760, %v1606_v19  ;;  %v1091_v47 = vmul.f32 %v1606_v19, %v1606_v19 }
  0xa8   :  { %v662_v21 = vsub.f32 %v1606_v19, %v575_v20  ;;  %1346 = vmatprep.subr.mxu1 %v575_v20  ;;  %v1098_v48 = vsel %vm65_vm0, %v1091_v47, 0.0 }
  0xa9   :  { %1347 = vmatpush3.msra.mxu1 %v575_v20 }
  0xaa   :  { %1349 = vmatmul.mubr.f32.vlgmr.msra.gmra.mrb[2].mxu1 %v153_v14  ;;  %v663_v22 = vand.u32 4294901760, %v662_v21 }
  0xab   :  { %1353 = vmatprep.mubr.f32.mxu1 %v1593_v5 }
  0xac   :  { %v664_v23 = vsub.f32 %v662_v21, %v663_v22 }
  0xae   :  { %v665_v24 = vand.u32 4294901760, %v664_v23 }
  0xb0   :  { %1351 = vmatprep.subr.mxu1 %v665_v24 }
  0xb1   :  { %1352 = vmatpush3.msra.mxu1 %v665_v24 }
  0xb2   :  { %1354 = vmatmul.mubr.f32.vlgmr.msra.gmra.mrb[2].mxu1 %v1591_v4  ;;  %1356 = vmatprep.subr.mxu1 %v662_v21 }
  0xb3   :  { %1357 = vmatpush3.msra.mxu1 %v662_v21  ;;  %1358 = vmatprep.mubr.f32.mxu1 %v140_v7 }
  0xb4   :  { %1361 = vmatprep.subr.mxu1 %v575_v20 }
  0xba   :  { %1359 = vmatmul.mubr.f32.vlgmr.msra.gmra.mrb[2].mxu1 %v150_v6 }
  0xbb   :  { %1362 = vmatpush3.msra.mxu1 %v575_v20  ;;  %1363 = vmatprep.mubr.f32.mxu1 %v141_v9 }
  0xbc   :  { %1366 = vmatprep.subr.mxu1 %v663_v22 }
  0xc2   :  { %1364 = vmatmul.mubr.f32.vlgmr.msra.gmra.mrb[2].mxu1 %v151_v10 }
  0xc3   :  { %1367 = vmatpush3.msra.mxu1 %v663_v22  ;;  %1368 = vmatprep.mubr.f32.mxu1 %v1593_v5 }
  0xc4   :  { %1371 = vmatprep.subr.mxu1 %v575_v20 }
  0xca   :  { %1369 = vmatmul.mubr.f32.vlgmr.msra.gmra.mrb[2].mxu1 %v1591_v4 }
  0xcb   :  { %1372 = vmatpush3.msra.mxu1 %v575_v20  ;;  %1373 = vmatprep.mubr.f32.mxu1 %v1593_v5 }
  0xd2   :  { %1374 = vmatmul.mubr.f32.vlgmr.msra.gmra.mrb[2].mxu1 %v1591_v4 }
 0x112   :  { %v1310_v25 = vpop.f32.mrb[0].mxu1 }
 0x113   :  { %v145_v26 = vpop.f32.mrb[1].mxu1 }
 0x13a   :  { %v1345_v33 = vpop.f32.mrb[0].mxu0 }
 0x13b   :  { %v1400_v37 = vadd.f32 %v1345_v33, %v1310_v25  ;;  %v564_v38 = vpop.f32.mrb[1].mxu0 }
 0x13c   :  { %v1401_v39 = vadd.f32 %v564_v38, %v145_v26 }
 0x13e   :  { %v1072_v42 = vsel %vm1071_vm4, %v1401_v39, %v1400_v37 }
 0x13f   :  { %v1089_v43 = vmul.f32 %v1072_v42, %v1072_v42  ;;  %v1083_v44 = vmul.f32 %v1082_v40, %v1072_v42 }
 0x141   :  { %1104 = vrot.lane.b32.xlu0 %v1089_v43, %s1529_s24  ;;  %v1086_v45 = vadd.f32 %v1085_v41, %v1083_v44  ;;  %v1092_v46 = vsel %vm65_vm0, %v1089_v43, 0.0 }
 0x143   :  { %1088 = vst.msk [vmem:[#allocation9] sm:$0xff] %vm1087_vm5, %v1086_v45 }
 0x160   :  { %1093 = vadd.xlane.f32.xlu0 %v1092_v46 }
 0x164   :  { %1099 = vadd.xlane.f32.xlu0 %v1098_v48 }
 0x1a5   :  { %v1375_v49 = vpop.f32.mrb[2].mxu1 }
 0x1a6   :  { %v1053_v50 = vpop.f32.mrb[3].mxu1 }
 0x1a7   :  { %v1073_v51 = vsel %vm1071_vm4, %v1375_v49, %v1053_v50 }
 0x1a8   :  { %v1090_v52 = vmul.f32 %v1073_v51, %v1073_v51 }
 0x1aa   :  { %1106 = vrot.lane.b32.xlu1 %v1090_v52, %s1529_s24  ;;  %v1095_v55 = vsel %vm65_vm0, %v1090_v52, 0.0 }
 0x1ae   :  { %1108 = vrot.lane.b32.xlu1 %v1091_v47, %s1529_s24 }
 0x1b3   :  { %v1105_v53 = vpop.permute.xlu0 %1104 }
 0x1b4   :  { %v1113_v54 = vsel %vm65_vm0, %v1105_v53, 0.0 }
 0x1b5   :  { %1114 = vadd.xlane.f32.xlu0 %v1113_v54 }
 0x1d2   :  { %1096 = vadd.xlane.f32.xlu1 %v1095_v55 }
 0x1ed   :  { %v1094_v58 = vpop.xlane.xlu0 %1093 }
 0x1ee   :  { %v1123_v61 = vsel %vm1122_vm6, %v1094_v58, 0.0 }
 0x1f1   :  { %v1100_v62 = vpop.xlane.xlu0 %1099 }
 0x1f2   :  { %v1167_v3 = vsel %vm1122_vm6, %v1100_v62, 0.0  ;;  %v1208_v62 = vstv %s1655_s26 }
 0x21c   :  { %v1107_v56 = vpop.permute.xlu1 %1106 }
 0x21d   :  { %v1116_v57 = vsel %vm65_vm0, %v1107_v56, 0.0 }
 0x21e   :  { %1117 = vadd.xlane.f32.xlu1 %v1116_v57 }
 0x220   :  { %v1109_v59 = vpop.permute.xlu1 %1108 }
 0x221   :  { %v1119_v60 = vsel %vm65_vm0, %v1109_v59, 0.0 }
 0x222   :  { %1120 = vadd.xlane.f32.xlu0 %v1119_v60  ;;  %1124 = vadd.xlane.f32.xlu1 %v1123_v61 }
 0x242   :  { %v1115_v63 = vpop.xlane.xlu0 %1114 }
 0x243   :  { %v1134_v0 = vsel %vm1122_vm6, %v1115_v63, 0.0 }
 0x244   :  { %1135 = vadd.xlane.f32.xlu0 %v1134_v0 }
 0x25f   :  { %v1097_v1 = vpop.xlane.xlu1 %1096 }
 0x260   :  { %v1145_v2 = vsel %vm1122_vm6, %v1097_v1, 0.0 }
 0x261   :  { %1146 = vadd.xlane.f32.xlu1 %v1145_v2 }
 0x265   :  { %1168 = vadd.xlane.f32.xlu1 %v1167_v3 }
 0x2ab   :  { %v1118_v4 = vpop.xlane.xlu1 %1117 }
 0x2ac   :  { %v1156_v5 = vsel %vm1122_vm6, %v1118_v4, 0.0 }
 0x2ad   :  { %1157 = vadd.xlane.f32.xlu0 %v1156_v5 }
 0x2af   :  { %v1121_v6 = vpop.xlane.xlu0 %1120  ;;  %v1125_v7 = vpop.xlane.xlu1 %1124 }
 0x2b0   :  { %v1126_v8 = vrot.slane %v1125_v7, 4  ;;  %v1178_v9 = vsel %vm1122_vm6, %v1121_v6, 0.0 }
 0x2b1   :  { %1179 = vadd.xlane.f32.xlu0 %v1178_v9  ;;  %v1199_v9 = vstv %s1659_s29 }
 0x2b2   :  { %v1127_v10 = vadd.f32 %v1126_v8, %v1125_v7  ;;  %v1214_v7 = vstv %s1657_s28  ;;  %v1194_v8 = vstv %s1193_s9 }
 0x2b4   :  { %v1128_v11 = vrot.slane %v1127_v10, 2 }
 0x2b6   :  { %v1129_v12 = vadd.f32 %v1128_v11, %v1127_v10  ;;  %v1203_v10 = vstv %s1661_s30 }
 0x2b8   :  { %v1130_v13 = vrot.slane %v1129_v12, 1 }
 0x2ba   :  { %v1131_v14 = vadd.f32 %v1130_v13, %v1129_v12 }
 0x2bc   :  { %1420 = vpush %v1131_v14 }
 0x2d1   :  { %v1136_v15 = vpop.xlane.xlu0 %1135 }
 0x2d2   :  { %v1137_v16 = vrot.slane %v1136_v15, 4 }
 0x2d4   :  { %v1138_v17 = vadd.f32 %v1137_v16, %v1136_v15  ;;  %v1210_v15 = vstv %s1664_s6 }
 0x2d6   :  { %v1139_v18 = vrot.slane %v1138_v17, 2 }
 0x2d8   :  { %v1140_v19 = vadd.f32 %v1139_v18, %v1138_v17  ;;  %v1216_v18 = vstv %s1668_s8 }
 0x2da   :  { %v1141_v20 = vrot.slane %v1140_v19, 1 }
 0x2dc   :  { %v1142_v21 = vadd.f32 %v1141_v20, %v1140_v19 }
 0x2de   :  { %1422 = vpush %v1142_v21 }
 0x2ed   :  { %s1421_s25 = spop %1420 }
 0x2ee   :  { %v1147_v22 = vpop.xlane.xlu1 %1146  ;;  %v1133_v54 = vstv %s1421_s25 }
 0x2ef   :  { %v1148_v23 = vrot.slane %v1147_v22, 4  ;;  %v1205_v60 = vmul.f32 %v1133_v54, %v1624_v31 }
 0x2f1   :  { %v1149_v24 = vadd.f32 %v1148_v23, %v1147_v22 }
 0x2f2   :  { %v1169_v29 = vpop.xlane.xlu1 %1168 }
 0x2f3   :  { %v1150_v25 = vrot.slane %v1149_v24, 2  ;;  %v1170_v33 = vrot.slane %v1169_v29, 4 }
 0x2f5   :  { %v1151_v26 = vadd.f32 %v1150_v25, %v1149_v24  ;;  %v1171_v34 = vadd.f32 %v1170_v33, %v1169_v29 }
 0x2f7   :  { %v1152_v27 = vrot.slane %v1151_v26, 1  ;;  %v1172_v35 = vrot.slane %v1171_v34, 2 }
 0x2f9   :  { %v1153_v28 = vadd.f32 %v1152_v27, %v1151_v26  ;;  %v1173_v40 = vadd.f32 %v1172_v35, %v1171_v34 }
 0x2fb   :  { %1424 = vpush %v1153_v28  ;;  %v1174_v46 = vrot.slane %v1173_v40, 1 }
 0x2fd   :  { %v1175_v51 = vadd.f32 %v1174_v46, %v1173_v40 }
 0x30f   :  { %s1423_s27 = spop %1422 }
 0x310   :  { %v1144_v56 = vstv %s1423_s27 }
 0x311   :  { %v1201_v63 = vmul.f32 %v1144_v56, %v1626_v32 }
 0x32c   :  { %s1425_s4 = spop %1424 }
 0x32d   :  { %v1155_v57 = vstv %s1425_s4 }
 0x32e   :  { %v1196_v0 = vmul.f32 %v1155_v57, %v1624_v31 }
 0x33a   :  { %v1158_v37 = vpop.xlane.xlu0 %1157 }
 0x33b   :  { %v1159_v38 = vrot.slane %v1158_v37, 4 }
 0x33d   :  { %v1160_v39 = vadd.f32 %v1159_v38, %v1158_v37 }
 0x33e   :  { %v1180_v41 = vpop.xlane.xlu0 %1179 }
 0x33f   :  { %v1161_v42 = vrot.slane %v1160_v39, 2  ;;  %v1181_v43 = vrot.slane %v1180_v41, 4 }
 0x341   :  { %v1182_v44 = vadd.f32 %v1181_v43, %v1180_v41  ;;  %v1162_v45 = vadd.f32 %v1161_v42, %v1160_v39 }
 0x343   :  { %v1183_v47 = vrot.slane %v1182_v44, 2  ;;  %v1163_v48 = vrot.slane %v1162_v45, 1 }
 0x345   :  { %v1184_v49 = vadd.f32 %v1183_v47, %v1182_v44  ;;  %v1164_v50 = vadd.f32 %v1163_v48, %v1162_v45 }
 0x347   :  { %1426 = vpush %v1164_v50  ;;  %v1185_v52 = vrot.slane %v1184_v49, 1 }
 0x348   :  { %1428 = vpush %v1175_v51 }
 0x349   :  { %v1186_v53 = vadd.f32 %v1185_v52, %v1184_v49 }
 0x34b   :  { %1430 = vpush %v1186_v53 }
 0x378   :  { %s1427_s0 = spop %1426 }
 0x379   :  { %v1166_v55 = vstv %s1427_s0  ;;  %s1429_s7 = spop %1428 }
 0x37a   :  { %v1212_v58 = vmul.f32 %v1166_v55, %v1626_v32  ;;  %v1177_v59 = vstv %s1429_s7 }
 0x37b   :  { %v1206_v61 = vmul.f32 %v1177_v59, %v1629_v36  ;;  %v1189_v3 = vmul.f32 %v1177_v59, %v1624_v31 }
 0x37c   :  { %s1431_s10 = spop %1430 }
 0x37d   :  { %v1207_v1 = vadd.f32 %v1206_v61, %v1205_v60  ;;  %v1188_v2 = vstv %s1431_s10  ;;  %v1213_v4 = vadd.f32 %v1212_v58, %v1206_v61 }
 0x37e   :  { %v1190_v5 = vmul.f32 %v1188_v2, %v1626_v32  ;;  %v1197_v6 = vmul.f32 %v1188_v2, %v1629_v36 }
 0x37f   :  { %v1209_v11 = vadd.f32 %v1208_v62, %v1207_v1  ;;  %v1215_v31 = vadd.f32 %v1214_v7, %v1213_v4 }
 0x380   :  { %v1191_v12 = vadd.f32 %v1190_v5, %v1189_v3  ;;  %v1198_v13 = vadd.f32 %v1197_v6, %v1196_v0  ;;  %v1202_v14 = vadd.f32 %v1201_v63, %v1197_v6 }
 0x381   :  { %v1211_v36 = vadd.f32 %v1210_v15, %v1209_v11  ;;  %v1217_v22 = vadd.f32 %v1216_v18, %v1215_v31 }
 0x382   :  { %v1195_v16 = vadd.f32 %v1194_v8, %v1191_v12  ;;  %v1200_v17 = vadd.f32 %v1199_v9, %v1198_v13  ;;  %v1204_v32 = vadd.f32 %v1203_v10, %v1202_v14 }
 0x383   :  { %v1227_v25 = vsel %vm1226_vm10, %v1211_v36, 0.0  ;;  %v1230_v27 = vsel %vm1229_vm11, %v1217_v22, 0.0 }
 0x384   :  { %v1219_v19 = vsel %vm1218_vm7, %v1195_v16, 0.0  ;;  %v1221_v20 = vsel %vm1220_vm8, %v1200_v17, 0.0  ;;  %v1224_v23 = vsel %vm1223_vm9, %v1204_v32, 0.0 }
 0x385   :  { %v1222_v21 = vadd.f32 %v1221_v20, %v1219_v19 }
 0x387   :  { %v1225_v24 = vadd.f32 %v1224_v23, %v1222_v21 }
 0x389   :  { %v1228_v26 = vadd.f32 %v1227_v25, %v1225_v24 }
 0x38b   :  { %v1231_v28 = vadd.f32 %v1230_v27, %v1228_v26 }
 0x38d   :  { %1233 = vst.msk [vmem:[#allocation9 + $0x8] sm:$0x1] %vm1232_vm12, %v1231_v28 }
 0x38e   :  { %1505 = shalt.err (!%p1502_p9)
}
 0x38f   :  { %s1506_s1 = scalar_lea.hbm %s1703_s3, 256 }
 0x390   :  { %p1507_p10 = scmp.ne.s32.totalorder %s1703_s3, %s1506_s1  ;;  %p1510_p11 = scmp.lt.u32.totalorder %s1506_s1, %s1703_s3 }
 0x392   :  { %p1512_p12 = pnand %p1510_p11, %p1507_p10 }
 0x394   :  { %1515 = shalt.err (!%p1512_p12)
}
 0x395   :  { %s1531_s20 = smov 128  }
 0x396   :  { %1245 = dma.vmem_to_hbm [thread:$0]  %s1240_s12, 256, %s1703_s3, [#allocation4], %s1531_s20, %s1531_s20, %s1527_s17  }
 0x397   :  { %1522 = dma.done.wait [#allocation4], 256  }
 0x398   :  { %1523 = vsyncadd [#allocation4], 4294967040 }
 0x399   :  { %1249 = vsyncpa [#allocation3], 1 }
 0x39a   :  { %1250 = vsyncpa [#allocation8], 1 }
 0x39b   :  { %1251 = vsyncpa [#allocation4], 1 }
 0x39c   :  { %1252 = vsyncpa [#allocation5], 1 }

</bundles_post_ra>
